<compile_context>
chip_gen: v7x
topology: tpu7x:2x2x1
jax: 0.10.0
libtpu: 0.0.40
codegen_flags: <defaults>
</compile_context>

<pallas_src>
import functools

import jax
import jax.numpy as jnp
from jax import lax
from jax.experimental import pallas as pl
from jax.experimental.pallas import tpu as pltpu

LANES = 128


@functools.lru_cache(maxsize=1)
def _chip_config():
    """Returns (num_tensorcores, default_block_rows, bf16_valu_ok)."""
    kind = ""
    try:
        kind = jax.devices()[0].device_kind.lower()
    except Exception:
        pass
    new_gen = ("v6" in kind) or ("v7" in kind)
    # Block sizes keep 2 inputs x 2 pipeline buffers within each generation's
    # *default* scoped-VMEM limit:
    #   v5e / unknown: 4096 rows -> 2 MiB/input ->  8 MiB double-buffered (16 MiB limit)
    #   v6e / v7x    : 8192 rows -> 4 MiB/input -> 16 MiB double-buffered (32 MiB limit)
    block_rows = 8192 if new_gen else 4096
    bf16_ok = new_gen  # v6e/v7x have bf16 VALUs; v5e does not
    num_cores = 1
    if "v7" in kind:   # v7x: 2 TensorCores per chip
        num_cores = 2
        try:
            info = pltpu.get_tpu_info()
            for attr in ("tensorcores_per_chip", "num_tensorcores",
                         "num_cores", "cores_per_chip", "core_count"):
                v = getattr(info, attr, None)
                if isinstance(v, int) and 1 <= v <= 8:
                    num_cores = v
                    break
        except Exception:
            pass
    return num_cores, block_rows, bf16_ok


def _dice_sums_kernel(o_ref, t_ref, out_ref, acc_i_ref, acc_s_ref, *,
                      rows, block_rows, bpc, any_ragged, bf16_math):
    """Accumulates [sum(t*o), sum(t+o)] as (1,128) lane vectors.

    o_ref, t_ref : (block_rows, LANES) VMEM tiles (native dtype)
    out_ref      : (2, LANES) VMEM output block (one row per accumulated sum)
    acc_*_ref    : (1, LANES) f32 VMEM scratch accumulators
    """
    c = pl.program_id(0)
    i = pl.program_id(1)

    @pl.when(i == 0)
    def _init():
        acc_i_ref[...] = jnp.zeros_like(acc_i_ref)
        acc_s_ref[...] = jnp.zeros_like(acc_s_ref)

    def accumulate_full():
        if bf16_math:
            # bf16 VALU fast path (v6e/v7x): elementwise in bf16, widen to f32
            # only at the per-tile reduction; running accumulation stays f32.
            o = o_ref[...]
            t = t_ref[...]
            prod = (t * o).astype(jnp.float32)
            ssum = (t + o).astype(jnp.float32)
        else:
            o = o_ref[...].astype(jnp.float32)
            t = t_ref[...].astype(jnp.float32)
            prod = t * o
            ssum = t + o
        acc_i_ref[...] += jnp.sum(prod, axis=0, keepdims=True)
        acc_s_ref[...] += jnp.sum(ssum, axis=0, keepdims=True)

    def accumulate_masked(row0):
        # Rare path: only the single ragged / overshoot tile pays for the mask.
        o = o_ref[...].astype(jnp.float32)
        t = t_ref[...].astype(jnp.float32)
        row_ids = lax.broadcasted_iota(jnp.int32, (block_rows, LANES), 0) + row0
        valid = row_ids < rows
        o = jnp.where(valid, o, 0.0)
        t = jnp.where(valid, t, 0.0)
        acc_i_ref[...] += jnp.sum(t * o, axis=0, keepdims=True)
        acc_s_ref[...] += jnp.sum(t + o, axis=0, keepdims=True)

    if any_ragged:
        row0 = (c * bpc + i) * block_rows
        is_full = row0 + block_rows <= rows

        @pl.when(is_full)
        def _():
            accumulate_full()

        @pl.when(jnp.logical_not(is_full))
        def _():
            accumulate_masked(row0)
    else:
        accumulate_full()

    @pl.when(i == pl.num_programs(1) - 1)
    def _finalize():
        out_ref[0:1, :] = acc_i_ref[...]
        out_ref[1:2, :] = acc_s_ref[...]


def _partial_sums(o2, t2, rows, block_rows, split, bf16_math):
    nblocks = pl.cdiv(rows, block_rows)
    split = max(1, min(split, nblocks))
    bpc = pl.cdiv(nblocks, split)          # blocks per core
    overshoot = split * bpc != nblocks
    any_ragged = (nblocks * block_rows != rows) or overshoot

    if overshoot:
        def in_map(c, i):
            # Overshooting grid steps re-read the last valid block; their
            # contribution is fully masked out inside the kernel.
            return (jnp.minimum(c * bpc + i, nblocks - 1), 0)
    else:
        def in_map(c, i):
            return (c * bpc + i, 0)

    kernel = functools.partial(
        _dice_sums_kernel, rows=rows, block_rows=block_rows, bpc=bpc,
        any_ragged=any_ragged, bf16_math=bf16_math)

    if split > 1:
        semantics = (getattr(pltpu, "CORE_PARALLEL", "parallel"),
                     getattr(pltpu, "ARBITRARY", "arbitrary"))
    else:
        semantics = ("arbitrary", "arbitrary")

    bytes_in = (o2.size * o2.dtype.itemsize) + (t2.size * t2.dtype.itemsize)
    cost = pl.CostEstimate(
        flops=4 * rows * LANES,
        transcendentals=0,
        bytes_accessed=bytes_in + split * 2 * LANES * 4,
    )

    return pl.pallas_call(
        kernel,
        out_shape=jax.ShapeDtypeStruct((split, 2, LANES), jnp.float32),
        grid_spec=pltpu.PrefetchScalarGridSpec(
            num_scalar_prefetch=0,
            grid=(split, bpc),
            in_specs=[
                pl.BlockSpec((block_rows, LANES), in_map),
                pl.BlockSpec((block_rows, LANES), in_map),
            ],
            out_specs=pl.BlockSpec((None, 2, LANES), lambda c, i: (c, 0, 0)),
            scratch_shapes=[
                pltpu.VMEM((1, LANES), jnp.float32),
                pltpu.VMEM((1, LANES), jnp.float32),
            ],
        ),
        compiler_params=pltpu.CompilerParams(dimension_semantics=semantics),
        cost_estimate=cost,
    )(o2, t2)


def soft_dice_loss(output, target, smooth=1.0, *, max_block_rows=None):
    """output, target: same-shaped arrays (e.g. (N,1,H,W)); returns scalar loss."""
    assert output.shape == target.shape
    num_cores, default_block_rows, bf16_ok = _chip_config()
    if max_block_rows is None:
        max_block_rows = default_block_rows

    o = output.reshape(-1)          # keep native dtype through the DMA
    t = target.reshape(-1)
    n = o.shape[0]

    pad = (-n) % LANES
    if pad:
        # Rare path: only triggers when numel % 128 != 0 (costs a copy).
        o = jnp.pad(o, (0, pad))
        t = jnp.pad(t, (0, pad))
    rows = (n + pad) // LANES
    o2 = o.reshape(rows, LANES)
    t2 = t.reshape(rows, LANES)

    if rows <= max_block_rows:
        block_rows = rows
    else:
        block_rows = max(8, (max_block_rows // 8) * 8)

    nblocks = pl.cdiv(rows, block_rows)
    # Only split across TensorCores on multi-core chips (v7x); on v5e/v6e a
    # split would just serialize, force masking, and re-read blocks.
    split = num_cores if (num_cores > 1 and nblocks >= num_cores) else 1

    bf16_math = bool(bf16_ok
                     and o2.dtype == jnp.bfloat16
                     and t2.dtype == jnp.bfloat16)

    try:
        partials = jax.block_until_ready(
            _partial_sums(o2, t2, rows, block_rows, split, bf16_math))
    except Exception:
        if split == 1:
            raise
        # Defensive fallback if core-parallel lowering is rejected on this chip.
        partials = jax.block_until_ready(
            _partial_sums(o2, t2, rows, block_rows, 1, bf16_math))

    intersection = jnp.sum(partials[:, 0, :])
    sum_t_plus_o = jnp.sum(partials[:, 1, :])
    dice = (2.0 * intersection + smooth) / (sum_t_plus_o + smooth)
    return 1.0 - dice


def soft_dice_loss_ref(output, target, smooth=1.0):
    t = target.reshape(-1).astype(jnp.float32)
    o = output.reshape(-1).astype(jnp.float32)
    inter = jnp.sum(t * o)
    dice = (2.0 * inter + smooth) / (jnp.sum(t) + jnp.sum(o) + smooth)
    return 1.0 - dice


def _make_inputs(key, shape, dtype=jnp.float32):
    k1, k2 = jax.random.split(key)
    output = jax.nn.sigmoid(jax.random.normal(k1, shape, dtype=jnp.float32))
    target = (jax.random.uniform(k2, shape) > 0.5).astype(jnp.float32)
    return output.astype(dtype), target.astype(dtype)


if __name__ == "__main__":
    base_key = jax.random.PRNGKey(0)

    # Primary small test consistent with the module's (N,1,H,W) contract.
    output, target = _make_inputs(base_key, (2, 1, 16, 16))
    loss = jax.block_until_ready(soft_dice_loss(output, target))
    ref = soft_dice_loss_ref(output, target)
    assert jnp.allclose(loss, ref, atol=1e-5, rtol=1e-5), (loss, ref)

    # Extra small cases exercising: multi-block accumulation, the ragged-tail
    # masked branch, the (possible) multi-core split + overshoot path,
    # non-default smooth, and the pad path.
    cases = [
        ((2, 1, 48, 64), 1.0, jnp.float32),   # rows=48, 6 blocks, no mask
        ((2, 1, 44, 64), 1.0, jnp.float32),   # rows=44, ragged last block -> mask branch
        ((2, 1, 40, 64), 0.5, jnp.float32),   # rows=40, 5 blocks (overshoot if split=2)
        ((2, 1, 10, 13), 1.0, jnp.float32),   # numel % 128 != 0 -> pad path
    ]
    for idx, (shape, smooth, dtype) in enumerate(cases):
        key = jax.random.fold_in(base_key, idx + 1)
        out_x, tgt_x = _make_inputs(key, shape, dtype)
        got = jax.block_until_ready(
            soft_dice_loss(out_x, tgt_x, smooth=smooth, max_block_rows=8))
        want = soft_dice_loss_ref(out_x, tgt_x, smooth=smooth)
        assert jnp.allclose(got, want, atol=1e-5, rtol=1e-5), (shape, got, want)

    # bf16 fast-path case (only takes the bf16 VALU route on v6e/v7x); the
    # looser tolerance covers the bf16 rounding of (t + o).
    out_b, tgt_b = _make_inputs(jax.random.fold_in(base_key, 99),
                                (2, 1, 32, 64), jnp.bfloat16)
    got_b = jax.block_until_ready(
        soft_dice_loss(out_b, tgt_b, max_block_rows=8))
    want_b = soft_dice_loss_ref(out_b, tgt_b)
    assert jnp.allclose(got_b, want_b, atol=2e-2, rtol=2e-2), (got_b, want_b)

    print("KERNEL_OK")
</pallas_src>

<mosaic_0001>
module attributes {stable_mosaic.version = 11 : i64} {
  func.func @_dice_sums_kernel(%arg0: i32, %arg1: i32, %arg2: memref<4x128xf32, #tpu.memory_space<vmem>>, %arg3: memref<4x128xf32, #tpu.memory_space<vmem>>, %arg4: memref<1x2x128xf32, #tpu.memory_space<vmem>>, %arg5: memref<1x128xf32, #tpu.memory_space<vmem>>, %arg6: memref<1x128xf32, #tpu.memory_space<vmem>>) attributes {dimension_semantics = [#tpu.dimension_semantics<arbitrary>, #tpu.dimension_semantics<arbitrary>], iteration_bounds = array<i64: 1, 1>, scalar_prefetch = 0 : i64, scratch_operands = 2 : i64, tpu.core_type = #tpu.core_type<tc>, window_params = [{transform_indices = @transform_0, window_bounds = array<i64: 4, 128>}, {transform_indices = @transform_1, window_bounds = array<i64: 4, 128>}, {transform_indices = @transform_2, window_bounds = array<i64: 1, 2, 128>}]} {
    %c0_i32 = arith.constant 0 : i32
    %0 = arith.cmpi eq, %arg1, %c0_i32 : i32
    %1 = arith.extui %0 : i1 to i32
    %c0_i32_0 = arith.constant 0 : i32
    %2 = arith.cmpi ne, %1, %c0_i32_0 : i32
    scf.if %2 {
      %cst_15 = arith.constant 0.000000e+00 : f32
      %20 = vector.broadcast %cst_15 : f32 to vector<1x128xf32>
      %c0_16 = arith.constant 0 : index
      %c0_17 = arith.constant 0 : index
      %21 = vector.load %arg5[%c0_16, %c0_17] : memref<1x128xf32, #tpu.memory_space<vmem>>, vector<1x128xf32>
      tpu.vector_store %arg5[%c0_16, %c0_17], %20 {strides = array<i32>} : memref<1x128xf32, #tpu.memory_space<vmem>>, vector<1x128xf32>,
      %cst_18 = arith.constant 0.000000e+00 : f32
      %22 = vector.broadcast %cst_18 : f32 to vector<1x128xf32>
      %c0_19 = arith.constant 0 : index
      %c0_20 = arith.constant 0 : index
      %23 = vector.load %arg6[%c0_19, %c0_20] : memref<1x128xf32, #tpu.memory_space<vmem>>, vector<1x128xf32>
      tpu.vector_store %arg6[%c0_19, %c0_20], %22 {strides = array<i32>} : memref<1x128xf32, #tpu.memory_space<vmem>>, vector<1x128xf32>,
    } else {
    }
    %c0 = arith.constant 0 : index
    %c0_1 = arith.constant 0 : index
    %3 = vector.load %arg2[%c0, %c0_1] : memref<4x128xf32, #tpu.memory_space<vmem>>, vector<4x128xf32>
    %c0_2 = arith.constant 0 : index
    %c0_3 = arith.constant 0 : index
    %4 = vector.load %arg3[%c0_2, %c0_3] : memref<4x128xf32, #tpu.memory_space<vmem>>, vector<4x128xf32>
    %5 = arith.mulf %4, %3 : vector<4x128xf32>
    %6 = arith.addf %4, %3 : vector<4x128xf32>
    %c0_4 = arith.constant 0 : index
    %c0_5 = arith.constant 0 : index
    %7 = vector.load %arg5[%c0_4, %c0_5] : memref<1x128xf32, #tpu.memory_space<vmem>>, vector<1x128xf32>
    %cst = arith.constant dense<0.000000e+00> : vector<128xf32>
    %8 = vector.multi_reduction <add>, %5, %cst [0] : vector<4x128xf32> to vector<128xf32>
    %9 = vector.shape_cast %8 : vector<128xf32> to vector<1x128xf32>
    %10 = arith.addf %7, %9 : vector<1x128xf32>
    %c0_6 = arith.constant 0 : index
    %c0_7 = arith.constant 0 : index
    %11 = vector.load %arg5[%c0_6, %c0_7] : memref<1x128xf32, #tpu.memory_space<vmem>>, vector<1x128xf32>
    tpu.vector_store %arg5[%c0_6, %c0_7], %10 {strides = array<i32>} : memref<1x128xf32, #tpu.memory_space<vmem>>, vector<1x128xf32>,
    %c0_8 = arith.constant 0 : index
    %c0_9 = arith.constant 0 : index
    %12 = vector.load %arg6[%c0_8, %c0_9] : memref<1x128xf32, #tpu.memory_space<vmem>>, vector<1x128xf32>
    %cst_10 = arith.constant dense<0.000000e+00> : vector<128xf32>
    %13 = vector.multi_reduction <add>, %6, %cst_10 [0] : vector<4x128xf32> to vector<128xf32>
    %14 = vector.shape_cast %13 : vector<128xf32> to vector<1x128xf32>
    %15 = arith.addf %12, %14 : vector<1x128xf32>
    %c0_11 = arith.constant 0 : index
    %c0_12 = arith.constant 0 : index
    %16 = vector.load %arg6[%c0_11, %c0_12] : memref<1x128xf32, #tpu.memory_space<vmem>>, vector<1x128xf32>
    tpu.vector_store %arg6[%c0_11, %c0_12], %15 {strides = array<i32>} : memref<1x128xf32, #tpu.memory_space<vmem>>, vector<1x128xf32>,
    %c0_i32_13 = arith.constant 0 : i32
    %17 = arith.cmpi eq, %arg1, %c0_i32_13 : i32
    %18 = arith.extui %17 : i1 to i32
    %c0_i32_14 = arith.constant 0 : i32
    %19 = arith.cmpi ne, %18, %c0_i32_14 : i32
    scf.if %19 {
      %c0_15 = arith.constant 0 : index
      %c0_16 = arith.constant 0 : index
      %20 = vector.load %arg5[%c0_15, %c0_16] : memref<1x128xf32, #tpu.memory_space<vmem>>, vector<1x128xf32>
      %c0_17 = arith.constant 0 : index
      %c0_18 = arith.constant 0 : index
      %c0_19 = arith.constant 0 : index
      %21 = vector.load %arg4[%c0_17, %c0_18, %c0_19] : memref<1x2x128xf32, #tpu.memory_space<vmem>>, vector<1x1x128xf32>
      %22 = vector.shape_cast %21 : vector<1x1x128xf32> to vector<1x128xf32>
      %23 = vector.shape_cast %20 : vector<1x128xf32> to vector<1x1x128xf32>
      tpu.vector_store %arg4[%c0_17, %c0_18, %c0_19], %23 {strides = array<i32>} : memref<1x2x128xf32, #tpu.memory_space<vmem>>, vector<1x1x128xf32>,
      %c0_20 = arith.constant 0 : index
      %c0_21 = arith.constant 0 : index
      %24 = vector.load %arg6[%c0_20, %c0_21] : memref<1x128xf32, #tpu.memory_space<vmem>>, vector<1x128xf32>
      %c0_22 = arith.constant 0 : index
      %c1 = arith.constant 1 : index
      %c0_23 = arith.constant 0 : index
      %25 = vector.load %arg4[%c0_22, %c1, %c0_23] : memref<1x2x128xf32, #tpu.memory_space<vmem>>, vector<1x1x128xf32>
      %26 = vector.shape_cast %25 : vector<1x1x128xf32> to vector<1x128xf32>
      %27 = vector.shape_cast %24 : vector<1x128xf32> to vector<1x1x128xf32>
      tpu.vector_store %arg4[%c0_22, %c1, %c0_23], %27 {strides = array<i32>} : memref<1x2x128xf32, #tpu.memory_space<vmem>>, vector<1x1x128xf32>,
    } else {
    }
    return
  }
  func.func @transform_0(%arg0: i32, %arg1: i32) -> (i32, i32) {
    %c1_i32 = arith.constant 1 : i32
    %0 = arith.muli %arg0, %c1_i32 : i32
    %1 = arith.addi %0, %arg1 : i32
    %c0_i32 = arith.constant 0 : i32
    %c0_i32_0 = arith.constant 0 : i32
    return %1, %c0_i32 : i32, i32
  }
  func.func @transform_1(%arg0: i32, %arg1: i32) -> (i32, i32) {
    %c1_i32 = arith.constant 1 : i32
    %0 = arith.muli %arg0, %c1_i32 : i32
    %1 = arith.addi %0, %arg1 : i32
    %c0_i32 = arith.constant 0 : i32
    %c0_i32_0 = arith.constant 0 : i32
    return %1, %c0_i32 : i32, i32
  }
  func.func @transform_2(%arg0: i32, %arg1: i32) -> (i32, i32, i32) {
    %c0_i32 = arith.constant 0 : i32
    %c0_i32_0 = arith.constant 0 : i32
    %c0_i32_1 = arith.constant 0 : i32
    return %arg0, %c0_i32, %c0_i32_0 : i32, i32, i32
  }
}

</mosaic_0001>

<bundles_post_ra>
// kernel: tpu_custom_call.1
= control target key start
LH: loop header
LB: loop body
LE: loop exit
PB: predicated region body
PF: predicated region fallthrough
CT: control target
= control target key end

     0   :  { %7 = vsyncpa [#allocation5], 0  ;;  %s229_s0 = inlined_call_operand.hbm [shape: f32[4,128], index: 0, kind: input, shape index: {}]   ;;  %s230_s1 = inlined_call_operand.hbm [shape: f32[4,128], index: 1, kind: input, shape index: {}]   ;;  %s231_s2 = inlined_call_operand.hbm [shape: f32[1,2,128], index: 2, kind: output, shape index: {}]  }
   0x1   :  { %8 = vsyncpa [#allocation8], 0 }
   0x2   :  { %9 = vsyncpa [#allocation6], 0  ;;  %s174_s9 = smov [#allocation4]   ;;  %s175_s11 = smov [#allocation7]  }
   0x3   :  { %s19_s10 = sshll.u32 %s174_s9, 4  ;;  %s32_s12 = sshll.u32 %s175_s11, 4  ;;  %s20_s10 = int_to_ptr.vmem [resolvable:$true] %s19_s10  ;;  %s33_s12 = int_to_ptr.vmem [resolvable:$true] %s32_s12 }
   0x4   :  { %s102_s15 = scalar_lea.hbm %s229_s0, 64 }
   0x5   :  { %p103_p0 = scmp.ne.s32.totalorder %s229_s0, %s102_s15  ;;  %p106_p1 = scmp.lt.u32.totalorder %s102_s15, %s229_s0 }
   0x7   :  { %p108_p2 = pnand %p106_p1, %p103_p0 }
   0x9   :  { %111 = shalt.err (!%p108_p2)
}
   0xa   :  { %s112_s20 = scalar_lea.vmem %s20_s10, 64  ;;  %p117_p4 = scmp.lt.s32.totalorder %s20_s10, %s20_s10 }
   0xb   :  { %p113_p3 = scmp.ne.s32.totalorder %s20_s10, %s112_s20  ;;  %p118_p5 = scmp.lt.s32.totalorder %s112_s20, %s112_s20 }
   0xd   :  { %p119_p6 = por %p118_p5, %p117_p4 }
   0xf   :  { %p120_p7 = pnand %p119_p6, %p113_p3 }
  0x11   :  { %123 = shalt.err (!%p120_p7)
}
  0x12   :  { %22 = dma.hbm_to_vmem [thread:$0]  %s229_s0, 64, %s20_s10, [#allocation5]  }
  0x13   :  { %s124_s25 = scalar_lea.hbm %s230_s1, 64 }
  0x14   :  { %p125_p8 = scmp.ne.s32.totalorder %s230_s1, %s124_s25  ;;  %p128_p9 = scmp.lt.u32.totalorder %s124_s25, %s230_s1 }
  0x16   :  { %p130_p10 = pnand %p128_p9, %p125_p8 }
  0x18   :  { %133 = shalt.err (!%p130_p10)
}
  0x19   :  { %s134_s30 = scalar_lea.vmem %s33_s12, 64  ;;  %p139_p12 = scmp.lt.s32.totalorder %s33_s12, %s33_s12 }
  0x1a   :  { %p135_p11 = scmp.ne.s32.totalorder %s33_s12, %s134_s30  ;;  %p140_p13 = scmp.lt.s32.totalorder %s134_s30, %s134_s30 }
  0x1c   :  { %p141_p0 = por %p140_p13, %p139_p12 }
  0x1e   :  { %p142_p1 = pnand %p141_p0, %p135_p11 }
  0x20   :  { %145 = shalt.err (!%p142_p1)
}
  0x21   :  { %35 = dma.hbm_to_vmem [thread:$0]  %s230_s1, 64, %s33_s12, [#allocation8]  }
  0x22   :  { %168 = dma.done.wait [#allocation5], 64  }
  0x23   :  { %169 = vsyncadd [#allocation5], 4294967232 }
  0x24   :  { %170 = dma.done.wait [#allocation8], 64  }
  0x25   :  { %171 = vsyncadd [#allocation8], 4294967232  ;;  %v176_v0 = vmov 0.0   ;;  %v50_v1 = vld [vmem:[#allocation4] sm:$0xf]  ;;  %vm55_vm0 = vcmask 1043456  }
  0x26   :  { %48 = vst [vmem:[#allocation2] sm:$0x1] %v176_v0  ;;  %49 = vst [vmem:[#allocation3] sm:$0x1] %v176_v0  ;;  %v51_v2 = vld [vmem:[#allocation7] sm:$0xf] }
  0x27   :  { %v52_v3 = vmul.f32 %v51_v2, %v50_v1  ;;  %v53_v4 = vadd.f32 %v51_v2, %v50_v1  ;;  %s177_s1 = smov [#allocation9]  }
  0x28   :  { %s88_s4 = sshll.u32 %s177_s1, 4  ;;  %s89_s4 = int_to_ptr.vmem [resolvable:$true] %s88_s4 }
  0x29   :  { %v56_v5 = vsel %vm55_vm0, %v52_v3, 0.0  ;;  %v66_v6 = vsel %vm55_vm0, %v53_v4, 0.0  ;;  %s146_s5 = scalar_lea.vmem %s89_s4, 32  ;;  %p151_p3 = scmp.lt.s32.totalorder %s89_s4, %s89_s4 }
  0x2a   :  { %v57_v7 = vrot.slane %v56_v5, 4  ;;  %v67_v8 = vrot.slane %v66_v6, 4  ;;  %p147_p2 = scmp.ne.s32.totalorder %s89_s4, %s146_s5  ;;  %p152_p4 = scmp.lt.s32.totalorder %s146_s5, %s146_s5 }
  0x2c   :  { %v58_v9 = vadd.f32 %v57_v7, %v56_v5  ;;  %v68_v10 = vadd.f32 %v67_v8, %v66_v6  ;;  %p153_p5 = por %p152_p4, %p151_p3 }
  0x2d   :  { %v54_v17 = vld [vmem:[#allocation2] sm:$0x1]  ;;  %v65_v18 = vld [vmem:[#allocation3] sm:$0x1] }
  0x2e   :  { %v59_v11 = vrot.slane %v58_v9, 2  ;;  %v69_v12 = vrot.slane %v68_v10, 2  ;;  %p154_p6 = pnand %p153_p5, %p147_p2 }
  0x30   :  { %v60_v13 = vadd.f32 %v59_v11, %v58_v9  ;;  %v70_v14 = vadd.f32 %v69_v12, %v68_v10 }
  0x32   :  { %v61_v15 = vrot.slane %v60_v13, 1  ;;  %v71_v16 = vrot.slane %v70_v14, 1 }
  0x34   :  { %v62_v19 = vadd.f32 %v61_v15, %v60_v13  ;;  %v72_v20 = vadd.f32 %v71_v16, %v70_v14 }
  0x36   :  { %v63_v21 = vadd.f32 %v62_v19, %v54_v17  ;;  %v73_v22 = vadd.f32 %v72_v20, %v65_v18 }
  0x38   :  { %64 = vst [vmem:[#allocation2] sm:$0x1] %v63_v21  ;;  %74 = vst [vmem:[#allocation3] sm:$0x1] %v73_v22 }
  0x3f   :  { %v78_v23 = vld [vmem:[#allocation2] sm:$0x1]  ;;  %v80_v24 = vld [vmem:[#allocation3] sm:$0x1] }
  0x40   :  { %79 = vst [vmem:[#allocation9] sm:$0x1] %v78_v23  ;;  %81 = vst [vmem:[#allocation9 + $0x1] sm:$0x1] %v80_v24 }
  0x41   :  { %157 = shalt.err (!%p154_p6)
}
  0x42   :  { %s158_s8 = scalar_lea.hbm %s231_s2, 32 }
  0x43   :  { %p159_p7 = scmp.ne.s32.totalorder %s231_s2, %s158_s8  ;;  %p162_p8 = scmp.lt.u32.totalorder %s158_s8, %s231_s2 }
  0x45   :  { %p164_p9 = pnand %p162_p8, %p159_p7 }
  0x47   :  { %167 = shalt.err (!%p164_p9)
}
  0x48   :  { %91 = dma.vmem_to_hbm [thread:$0]  %s89_s4, 32, %s231_s2, [#allocation6]  }
  0x49   :  { %172 = dma.done.wait [#allocation6], 32  }
  0x4a   :  { %173 = vsyncadd [#allocation6], 4294967264 }
  0x4b   :  { %95 = vsyncpa [#allocation5], 1 }
  0x4c   :  { %96 = vsyncpa [#allocation8], 1 }
  0x4d   :  { %97 = vsyncpa [#allocation6], 1 }

</bundles_post_ra>
